<compile_context>
chip_gen: v7x
topology: tpu7x:2x2x1
jax: 0.10.0
libtpu: 0.0.40
codegen_flags: <defaults>
</compile_context>

<pallas_src>
import collections
import functools

import jax
import jax.numpy as jnp
from jax.experimental import pallas as pl
from jax.experimental.pallas import tpu as pltpu


_LANES = 128
# Packed running-state layout inside the (1, 128) f32 slab.
_COUNT, _SUM, _M2, _STD = 0, 1, 2, 3


# ----------------------------------------------------------------------------
# Pallas kernel: streaming single-pass running-moment update.
# ----------------------------------------------------------------------------
def _running_moments_kernel(
    reward_ref,   # (TR, 128) f32 VMEM   -- current row-tile of the reward batch
    state_ref,    # (1, 128)  f32 SMEM   -- packed running state (count, sum, m2, std)
    out_ref,      # (1, 128)  f32 VMEM   -- packed updated state (aliased with input)
    mean_acc,     # (SUB, 128) f32 VMEM scratch -- per-stream running mean
    m2_acc,       # (SUB, 128) f32 VMEM scratch -- per-stream running M2
    *,
    sub: int,
    tile_rows: int,
    total_rows: int,
):
    g = pl.program_id(0)

    @pl.when(g == 0)
    def _init():
        mean_acc[...] = jnp.zeros_like(mean_acc)
        m2_acc[...] = jnp.zeros_like(m2_acc)

    nb = tile_rows // sub          # elements per stream contributed by this tile
    nb_f = float(nb)
    tile = reward_ref[...]         # (TR, 128)

    # Per-stream (SUB, 128) single-pass tile statistics -- elementwise / VPU only,
    # no cross-lane reduction here.
    if sub == 1:
        ts = jnp.sum(tile, axis=0, keepdims=True)              # (1, 128)
        tm = ts * (1.0 / nb_f)                                 # tile per-lane mean
        d = tile - tm
        tm2 = jnp.sum(d * d, axis=0, keepdims=True)            # (1, 128)
    else:
        rt = tile.reshape(tile_rows // sub, sub, _LANES)       # (nb, SUB, 128)
        ts = jnp.sum(rt, axis=0)                               # (SUB, 128)
        tm = ts * (1.0 / nb_f)
        d = rt - tm[None]
        tm2 = jnp.sum(d * d, axis=0)                           # (SUB, 128)

    # Chan / Welford merge of this tile into the per-stream accumulators.
    # n_a = g * nb, n_b = nb  =>  n_b/(n_a+n_b) = 1/(g+1),
    #                             n_a*n_b/(n_a+n_b) = nb * g/(g+1)
    g_v = jnp.full((1, 1), g, dtype=jnp.float32)
    inv_gp1 = 1.0 / (g_v + 1.0)
    c_m2 = (nb_f * g_v) * inv_gp1
    delta = tm - mean_acc[...]
    m2_acc[...] = m2_acc[...] + tm2 + (delta * delta) * c_m2
    mean_acc[...] = mean_acc[...] + delta * inv_gp1

    @pl.when(g == pl.num_programs(0) - 1)
    def _finalize():
        n_stream = float(total_rows // sub)       # per-stream total element count
        new_count = float(total_rows * _LANES)    # batch element count

        means = mean_acc[...]                     # (SUB, 128)
        m2s = m2_acc[...]                         # (SUB, 128)

        def _sum11(x):                            # full reduce -> (1, 1), XLU used once
            return jnp.sum(jnp.sum(x, axis=1, keepdims=True), axis=0, keepdims=True)

        # Combine the equal-count per-lane streams into whole-batch statistics.
        batch_sum = n_stream * _sum11(means)                       # (1, 1)
        batch_mean = batch_sum * (1.0 / new_count)
        dm = means - batch_mean
        batch_m2 = _sum11(m2s) + n_stream * _sum11(dm * dm)        # sum((r - batch_mean)^2)

        # Merge with the running buffers (same formula as the PyTorch reference).
        prev_count = jnp.full((1, 1), state_ref[0, _COUNT])
        prev_sum = jnp.full((1, 1), state_ref[0, _SUM])
        prev_m2 = jnp.full((1, 1), state_ref[0, _M2])

        curr_mean = prev_sum / prev_count
        mean_diff = batch_mean - curr_mean
        new_m2 = batch_m2 + (prev_count * new_count) / (prev_count + new_count) * (
            mean_diff * mean_diff
        )

        tot_count = prev_count + new_count
        tot_sum = prev_sum + batch_sum
        tot_m2 = prev_m2 + new_m2
        std = jnp.sqrt(tot_m2 / tot_count)

        # Lane-dense packed output: one (1, 128) vector store instead of four
        # masked (1, 1) stores / padded tiles.
        lane = jax.lax.broadcasted_iota(jnp.int32, (1, _LANES), 1)
        out_ref[...] = (
            jnp.where(lane == _COUNT, tot_count, 0.0)
            + jnp.where(lane == _SUM, tot_sum, 0.0)
            + jnp.where(lane == _M2, tot_m2, 0.0)
            + jnp.where(lane == _STD, std, 0.0)
        )


def _pick_tiling(total_rows: int):
    """Pick (tile_rows, sub-lane stream height) for the row grid."""
    if total_rows % 8 == 0:
        for tr in (512, 256, 128, 64, 32, 16, 8):
            if total_rows % tr == 0:
                return tr, 8
    # Small / ragged row count: single full-extent block, 128 per-lane streams.
    return total_rows, 1


@functools.partial(jax.jit, donate_argnums=(1,))
def _update_state_pallas(reward_2d, state):
    """reward_2d: (R, 128) f32; state: (1, 128) packed f32. Returns new packed state."""
    total_rows, lanes = reward_2d.shape
    assert lanes == _LANES
    tile_rows, sub = _pick_tiling(total_rows)
    grid = (total_rows // tile_rows,)

    tile_bytes = tile_rows * _LANES * 4
    # Small, v7x-safe VMEM budget: double-buffered tile + temporaries + slack.
    vmem_limit = int(min(max(10 * tile_bytes, 4 * 1024 * 1024), 32 * 1024 * 1024))

    kernel = functools.partial(
        _running_moments_kernel, sub=sub, tile_rows=tile_rows, total_rows=total_rows
    )

    return pl.pallas_call(
        kernel,
        out_shape=jax.ShapeDtypeStruct((1, _LANES), jnp.float32),
        grid=grid,
        in_specs=[
            pl.BlockSpec((tile_rows, _LANES), lambda i: (i, 0)),
            pl.BlockSpec(memory_space=pltpu.MemorySpace.SMEM),
        ],
        out_specs=pl.BlockSpec((1, _LANES), lambda i: (0, 0)),
        scratch_shapes=[
            pltpu.VMEM((sub, _LANES), jnp.float32),
            pltpu.VMEM((sub, _LANES), jnp.float32),
        ],
        input_output_aliases={1: 0},   # update running state in place (P8)
        compiler_params=pltpu.CompilerParams(
            dimension_semantics=("arbitrary",),
            vmem_limit_bytes=vmem_limit,
        ),
    )(reward_2d, state)


# ----------------------------------------------------------------------------
# JAX-side mirror of the PyTorch base class.
# ----------------------------------------------------------------------------
class NetHackNet:
    """Skeleton mirror of torchbeast NetHackNet with a Pallas-backed moment tracker."""

    AgentOutput = collections.namedtuple("AgentOutput", "action policy_logits baseline")

    def __init__(self):
        # register_buffer equivalents, packed into one lane-dense (1, 128) slab:
        # [count=1e-8, sum=0, m2=0, std=0, <unused>...]
        self._state = jnp.zeros((1, _LANES), jnp.float32).at[0, _COUNT].set(1e-8)

    # --- buffer views -------------------------------------------------------
    @property
    def reward_count(self):
        return self._state[0, _COUNT]

    @property
    def reward_sum(self):
        return self._state[0, _SUM]

    @property
    def reward_m2(self):
        return self._state[0, _M2]

    # --- torchbeast skeleton API ---------------------------------------------
    def forward(self, inputs, core_state):
        # TODO(synk): base class forward raises NotImplementedError in PyTorch; no
        # concrete network to translate here.
        raise NotImplementedError

    def initial_state(self, batch_size=1):
        return ()

    def update_running_moments(self, reward_batch):
        """Maintains a running mean/variance of the reward (Pallas TPU kernel)."""
        assert reward_batch.ndim == 1, "pass a flat 1-D reward batch"
        n = reward_batch.shape[0]
        # TODO(synk): if callers ever need lengths that are not a multiple of 128,
        # add a masked-tail path (plain zero padding would bias count/mean/m2).
        assert n > 0 and n % _LANES == 0, "reward batch length must be a multiple of 128"
        reward_2d = reward_batch.reshape(n // _LANES, _LANES).astype(jnp.float32)
        self._state = _update_state_pallas(reward_2d, self._state)
        return self._state[0, _STD]   # convenience: running std after this update

    def get_running_std(self):
        return jnp.sqrt(self.reward_m2 / self.reward_count)


# ----------------------------------------------------------------------------
# Pure-JAX reference (mirrors the PyTorch formulas exactly) for correctness.
# ----------------------------------------------------------------------------
def _reference_update(reward_batch, reward_sum, reward_m2, reward_count):
    new_count = reward_batch.shape[0]
    new_sum = jnp.sum(reward_batch)
    new_mean = new_sum / new_count
    curr_mean = reward_sum / reward_count
    new_m2 = jnp.sum((reward_batch - new_mean) ** 2) + reward_count * new_count / (
        reward_count + new_count
    ) * (new_mean - curr_mean) ** 2
    reward_count = reward_count + new_count
    reward_sum = reward_sum + new_sum
    reward_m2 = reward_m2 + new_m2
    return reward_count, reward_sum, reward_m2, jnp.sqrt(reward_m2 / reward_count)


if __name__ == "__main__":
    key = jax.random.PRNGKey(0)
    k1, k2, k3 = jax.random.split(key, 3)
    # Three deterministic reward batches that exercise all kernel paths:
    #   b1: 256 rewards   -> 2 rows    (single block, per-lane streams)
    #   b2: 2048 rewards  -> 16 rows   (single (8,128)-stream block)
    #   b3: 131072 rewards-> 1024 rows (tiled grid: 2 tiles of 512 rows, pipelined)
    b1 = jax.random.normal(k1, (256,), dtype=jnp.float32) * 3.0 + 1.5
    b2 = jax.random.normal(k2, (2048,), dtype=jnp.float32) * 0.5 - 2.0
    b3 = jax.random.normal(k3, (128 * 1024,), dtype=jnp.float32) * 2.0 + 0.25

    net = NetHackNet()
    std1 = net.update_running_moments(b1)
    std2 = net.update_running_moments(b2)
    std3 = net.update_running_moments(b3)
    jax.block_until_ready((std1, std2, std3, net._state))

    # Reference check in plain JAX (scalar buffers).
    r_sum = jnp.float32(0.0)
    r_m2 = jnp.float32(0.0)
    r_count = jnp.float32(1e-8)
    r_count, r_sum, r_m2, ref_std1 = _reference_update(b1, r_sum, r_m2, r_count)
    r_count, r_sum, r_m2, ref_std2 = _reference_update(b2, r_sum, r_m2, r_count)
    r_count, r_sum, r_m2, ref_std3 = _reference_update(b3, r_sum, r_m2, r_count)

    assert jnp.allclose(std1, ref_std1, rtol=1e-4, atol=1e-5), (std1, ref_std1)
    assert jnp.allclose(std2, ref_std2, rtol=1e-4, atol=1e-5), (std2, ref_std2)
    assert jnp.allclose(std3, ref_std3, rtol=1e-4, atol=1e-5), (std3, ref_std3)
    assert jnp.allclose(net.reward_count, r_count, rtol=1e-6), (net.reward_count, r_count)
    assert jnp.allclose(net.reward_sum, r_sum, rtol=1e-4, atol=1e-2), (net.reward_sum, r_sum)
    assert jnp.allclose(net.reward_m2, r_m2, rtol=1e-4, atol=1e-1), (net.reward_m2, r_m2)
    assert jnp.allclose(net.get_running_std(), ref_std3, rtol=1e-4, atol=1e-5)

    print("KERNEL_OK")
</pallas_src>

<mosaic_0001>
module attributes {stable_mosaic.version = 11 : i64} {
  func.func @_running_moments_kernel(%arg0: i32, %arg1: memref<2x128xf32, #tpu.memory_space<vmem>>, %arg2: memref<1x128xf32, #tpu.memory_space<smem>>, %arg3: memref<1x128xf32, #tpu.memory_space<vmem>>, %arg4: memref<1x128xf32, #tpu.memory_space<vmem>>, %arg5: memref<1x128xf32, #tpu.memory_space<vmem>>) attributes {dimension_semantics = [#tpu.dimension_semantics<arbitrary>], iteration_bounds = array<i64: 1>, scalar_prefetch = 0 : i64, scratch_operands = 2 : i64, tpu.core_type = #tpu.core_type<tc>, window_params = [{transform_indices = @transform_0, window_bounds = array<i64: 2, 128>}, {transform_indices = @transform_1, window_bounds = array<i64: 1, 128>}, {pipeline_mode = #tpu.pipeline_mode<synchronous>, transform_indices = @transform_2, window_bounds = array<i64: 1, 128>}]} {
    %c0_i32 = arith.constant 0 : i32
    %0 = arith.cmpi eq, %arg0, %c0_i32 : i32
    %1 = arith.extui %0 : i1 to i32
    %c0_i32_0 = arith.constant 0 : i32
    %2 = arith.cmpi ne, %1, %c0_i32_0 : i32
    scf.if %2 {
      %cst_19 = arith.constant 0.000000e+00 : f32
      %39 = vector.broadcast %cst_19 : f32 to vector<1x128xf32>
      %c0_20 = arith.constant 0 : index
      %c0_21 = arith.constant 0 : index
      %40 = vector.load %arg4[%c0_20, %c0_21] : memref<1x128xf32, #tpu.memory_space<vmem>>, vector<1x128xf32>
      tpu.vector_store %arg4[%c0_20, %c0_21], %39 {strides = array<i32>} : memref<1x128xf32, #tpu.memory_space<vmem>>, vector<1x128xf32>,
      %cst_22 = arith.constant 0.000000e+00 : f32
      %41 = vector.broadcast %cst_22 : f32 to vector<1x128xf32>
      %c0_23 = arith.constant 0 : index
      %c0_24 = arith.constant 0 : index
      %42 = vector.load %arg5[%c0_23, %c0_24] : memref<1x128xf32, #tpu.memory_space<vmem>>, vector<1x128xf32>
      tpu.vector_store %arg5[%c0_23, %c0_24], %41 {strides = array<i32>} : memref<1x128xf32, #tpu.memory_space<vmem>>, vector<1x128xf32>,
    } else {
    }
    %c0 = arith.constant 0 : index
    %c0_1 = arith.constant 0 : index
    %3 = vector.load %arg1[%c0, %c0_1] : memref<2x128xf32, #tpu.memory_space<vmem>>, vector<2x128xf32>
    %cst = arith.constant dense<0.000000e+00> : vector<128xf32>
    %4 = vector.multi_reduction <add>, %3, %cst [0] : vector<2x128xf32> to vector<128xf32>
    %5 = vector.shape_cast %4 : vector<128xf32> to vector<1x128xf32>
    %cst_2 = arith.constant 5.000000e-01 : f32
    %6 = vector.broadcast %cst_2 : f32 to vector<1x128xf32>
    %7 = arith.mulf %5, %6 : vector<1x128xf32>
    %8 = vector.broadcast %7 : vector<1x128xf32> to vector<2x128xf32>
    %9 = arith.subf %3, %8 : vector<2x128xf32>
    %10 = arith.mulf %9, %9 : vector<2x128xf32>
    %cst_3 = arith.constant dense<0.000000e+00> : vector<128xf32>
    %11 = vector.multi_reduction <add>, %10, %cst_3 [0] : vector<2x128xf32> to vector<128xf32>
    %12 = vector.shape_cast %11 : vector<128xf32> to vector<1x128xf32>
    %13 = arith.sitofp %arg0 : i32 to f32
    %14 = vector.broadcast %13 : f32 to vector<1x1xf32>
    %cst_4 = arith.constant 1.000000e+00 : f32
    %15 = vector.broadcast %cst_4 : f32 to vector<1x1xf32>
    %16 = arith.addf %14, %15 : vector<1x1xf32>
    %cst_5 = arith.constant 1.000000e+00 : f32
    %17 = vector.broadcast %cst_5 : f32 to vector<1x1xf32>
    %18 = arith.divf %17, %16 : vector<1x1xf32>
    %cst_6 = arith.constant 2.000000e+00 : f32
    %19 = vector.broadcast %cst_6 : f32 to vector<1x1xf32>
    %20 = arith.mulf %19, %14 : vector<1x1xf32>
    %21 = arith.mulf %20, %18 : vector<1x1xf32>
    %c0_7 = arith.constant 0 : index
    %c0_8 = arith.constant 0 : index
    %22 = vector.load %arg4[%c0_7, %c0_8] : memref<1x128xf32, #tpu.memory_space<vmem>>, vector<1x128xf32>
    %23 = arith.subf %7, %22 : vector<1x128xf32>
    %c0_9 = arith.constant 0 : index
    %c0_10 = arith.constant 0 : index
    %24 = vector.load %arg5[%c0_9, %c0_10] : memref<1x128xf32, #tpu.memory_space<vmem>>, vector<1x128xf32>
    %25 = arith.addf %24, %12 : vector<1x128xf32>
    %26 = arith.mulf %23, %23 : vector<1x128xf32>
    %27 = vector.broadcast %21 : vector<1x1xf32> to vector<1x128xf32>
    %28 = arith.mulf %26, %27 : vector<1x128xf32>
    %29 = arith.addf %25, %28 : vector<1x128xf32>
    %c0_11 = arith.constant 0 : index
    %c0_12 = arith.constant 0 : index
    %30 = vector.load %arg5[%c0_11, %c0_12] : memref<1x128xf32, #tpu.memory_space<vmem>>, vector<1x128xf32>
    tpu.vector_store %arg5[%c0_11, %c0_12], %29 {strides = array<i32>} : memref<1x128xf32, #tpu.memory_space<vmem>>, vector<1x128xf32>,
    %c0_13 = arith.constant 0 : index
    %c0_14 = arith.constant 0 : index
    %31 = vector.load %arg4[%c0_13, %c0_14] : memref<1x128xf32, #tpu.memory_space<vmem>>, vector<1x128xf32>
    %32 = vector.broadcast %18 : vector<1x1xf32> to vector<1x128xf32>
    %33 = arith.mulf %23, %32 : vector<1x128xf32>
    %34 = arith.addf %31, %33 : vector<1x128xf32>
    %c0_15 = arith.constant 0 : index
    %c0_16 = arith.constant 0 : index
    %35 = vector.load %arg4[%c0_15, %c0_16] : memref<1x128xf32, #tpu.memory_space<vmem>>, vector<1x128xf32>
    tpu.vector_store %arg4[%c0_15, %c0_16], %34 {strides = array<i32>} : memref<1x128xf32, #tpu.memory_space<vmem>>, vector<1x128xf32>,
    %c0_i32_17 = arith.constant 0 : i32
    %36 = arith.cmpi eq, %arg0, %c0_i32_17 : i32
    %37 = arith.extui %36 : i1 to i32
    %c0_i32_18 = arith.constant 0 : i32
    %38 = arith.cmpi ne, %37, %c0_i32_18 : i32
    scf.if %38 {
      %c0_19 = arith.constant 0 : index
      %c0_20 = arith.constant 0 : index
      %39 = vector.load %arg4[%c0_19, %c0_20] : memref<1x128xf32, #tpu.memory_space<vmem>>, vector<1x128xf32>
      %c0_21 = arith.constant 0 : index
      %c0_22 = arith.constant 0 : index
      %40 = vector.load %arg5[%c0_21, %c0_22] : memref<1x128xf32, #tpu.memory_space<vmem>>, vector<1x128xf32>
      %cst_23 = arith.constant dense<0.000000e+00> : vector<1xf32>
      %41 = vector.multi_reduction <add>, %39, %cst_23 [1] : vector<1x128xf32> to vector<1xf32>
      %42 = vector.shape_cast %41 : vector<1xf32> to vector<1x1xf32>
      %cst_24 = arith.constant dense<0.000000e+00> : vector<1xf32>
      %43 = vector.multi_reduction <add>, %42, %cst_24 [0] : vector<1x1xf32> to vector<1xf32>
      %44 = vector.shape_cast %43 : vector<1xf32> to vector<1x1xf32>
      %cst_25 = arith.constant 2.000000e+00 : f32
      %45 = vector.broadcast %cst_25 : f32 to vector<1x1xf32>
      %46 = arith.mulf %45, %44 : vector<1x1xf32>
      %cst_26 = arith.constant 3.906250e-03 : f32
      %47 = vector.broadcast %cst_26 : f32 to vector<1x1xf32>
      %48 = arith.mulf %46, %47 : vector<1x1xf32>
      %49 = vector.broadcast %48 : vector<1x1xf32> to vector<1x128xf32>
      %50 = arith.subf %39, %49 : vector<1x128xf32>
      %cst_27 = arith.constant dense<0.000000e+00> : vector<1xf32>
      %51 = vector.multi_reduction <add>, %40, %cst_27 [1] : vector<1x128xf32> to vector<1xf32>
      %52 = vector.shape_cast %51 : vector<1xf32> to vector<1x1xf32>
      %cst_28 = arith.constant dense<0.000000e+00> : vector<1xf32>
      %53 = vector.multi_reduction <add>, %52, %cst_28 [0] : vector<1x1xf32> to vector<1xf32>
      %54 = vector.shape_cast %53 : vector<1xf32> to vector<1x1xf32>
      %55 = arith.mulf %50, %50 : vector<1x128xf32>
      %cst_29 = arith.constant dense<0.000000e+00> : vector<1xf32>
      %56 = vector.multi_reduction <add>, %55, %cst_29 [1] : vector<1x128xf32> to vector<1xf32>
      %57 = vector.shape_cast %56 : vector<1xf32> to vector<1x1xf32>
      %cst_30 = arith.constant dense<0.000000e+00> : vector<1xf32>
      %58 = vector.multi_reduction <add>, %57, %cst_30 [0] : vector<1x1xf32> to vector<1xf32>
      %59 = vector.shape_cast %58 : vector<1xf32> to vector<1x1xf32>
      %cst_31 = arith.constant 2.000000e+00 : f32
      %60 = vector.broadcast %cst_31 : f32 to vector<1x1xf32>
      %61 = arith.mulf %60, %59 : vector<1x1xf32>
      %62 = arith.addf %54, %61 : vector<1x1xf32>
      %c0_32 = arith.constant 0 : index
      %c0_33 = arith.constant 0 : index
      %63 = memref.load %arg2[%c0_32, %c0_33] : memref<1x128xf32, #tpu.memory_space<smem>>
      %64 = vector.broadcast %63 : f32 to vector<1x1xf32>
      %c0_34 = arith.constant 0 : index
      %c1 = arith.constant 1 : index
      %65 = memref.load %arg2[%c0_34, %c1] : memref<1x128xf32, #tpu.memory_space<smem>>
      %66 = vector.broadcast %65 : f32 to vector<1x1xf32>
      %c0_35 = arith.constant 0 : index
      %c2 = arith.constant 2 : index
      %67 = memref.load %arg2[%c0_35, %c2] : memref<1x128xf32, #tpu.memory_space<smem>>
      %68 = vector.broadcast %67 : f32 to vector<1x1xf32>
      %69 = arith.divf %66, %64 : vector<1x1xf32>
      %70 = arith.subf %48, %69 : vector<1x1xf32>
      %cst_36 = arith.constant 2.560000e+02 : f32
      %71 = vector.broadcast %cst_36 : f32 to vector<1x1xf32>
      %72 = arith.mulf %64, %71 : vector<1x1xf32>
      %cst_37 = arith.constant 2.560000e+02 : f32
      %73 = vector.broadcast %cst_37 : f32 to vector<1x1xf32>
      %74 = arith.addf %64, %73 : vector<1x1xf32>
      %75 = arith.divf %72, %74 : vector<1x1xf32>
      %76 = arith.mulf %70, %70 : vector<1x1xf32>
      %77 = arith.mulf %75, %76 : vector<1x1xf32>
      %78 = arith.addf %62, %77 : vector<1x1xf32>
      %cst_38 = arith.constant 2.560000e+02 : f32
      %79 = vector.broadcast %cst_38 : f32 to vector<1x1xf32>
      %80 = arith.addf %64, %79 : vector<1x1xf32>
      %81 = arith.addf %66, %46 : vector<1x1xf32>
      %82 = arith.addf %68, %78 : vector<1x1xf32>
      %83 = arith.divf %82, %80 : vector<1x1xf32>
      %84 = math.sqrt %83 : vector<1x1xf32>
      %85 = tpu.iota {dimensions = array<i32: 1>} : vector<1x128xi32>
      %c0_i32_39 = arith.constant 0 : i32
      %86 = vector.broadcast %c0_i32_39 : i32 to vector<1x128xi32>
      %87 = arith.cmpi eq, %85, %86 : vector<1x128xi32>
      %cst_40 = arith.constant 0.000000e+00 : f32
      %88 = vector.shape_cast %80 : vector<1x1xf32> to vector<1x1xf32>
      %89 = vector.broadcast %88 : vector<1x1xf32> to vector<1x128xf32>
      %90 = vector.broadcast %cst_40 : f32 to vector<1x128xf32>
      %91 = arith.select %87, %89, %90 : vector<1x128xi1>, vector<1x128xf32>
      %c1_i32 = arith.constant 1 : i32
      %92 = vector.broadcast %c1_i32 : i32 to vector<1x128xi32>
      %93 = arith.cmpi eq, %85, %92 : vector<1x128xi32>
      %cst_41 = arith.constant 0.000000e+00 : f32
      %94 = vector.shape_cast %81 : vector<1x1xf32> to vector<1x1xf32>
      %95 = vector.broadcast %94 : vector<1x1xf32> to vector<1x128xf32>
      %96 = vector.broadcast %cst_41 : f32 to vector<1x128xf32>
      %97 = arith.select %93, %95, %96 : vector<1x128xi1>, vector<1x128xf32>
      %98 = arith.addf %91, %97 : vector<1x128xf32>
      %c2_i32 = arith.constant 2 : i32
      %99 = vector.broadcast %c2_i32 : i32 to vector<1x128xi32>
      %100 = arith.cmpi eq, %85, %99 : vector<1x128xi32>
      %cst_42 = arith.constant 0.000000e+00 : f32
      %101 = vector.shape_cast %82 : vector<1x1xf32> to vector<1x1xf32>
      %102 = vector.broadcast %101 : vector<1x1xf32> to vector<1x128xf32>
      %103 = vector.broadcast %cst_42 : f32 to vector<1x128xf32>
      %104 = arith.select %100, %102, %103 : vector<1x128xi1>, vector<1x128xf32>
      %105 = arith.addf %98, %104 : vector<1x128xf32>
      %c3_i32 = arith.constant 3 : i32
      %106 = vector.broadcast %c3_i32 : i32 to vector<1x128xi32>
      %107 = arith.cmpi eq, %85, %106 : vector<1x128xi32>
      %cst_43 = arith.constant 0.000000e+00 : f32
      %108 = vector.shape_cast %84 : vector<1x1xf32> to vector<1x1xf32>
      %109 = vector.broadcast %108 : vector<1x1xf32> to vector<1x128xf32>
      %110 = vector.broadcast %cst_43 : f32 to vector<1x128xf32>
      %111 = arith.select %107, %109, %110 : vector<1x128xi1>, vector<1x128xf32>
      %112 = arith.addf %105, %111 : vector<1x128xf32>
      %c0_44 = arith.constant 0 : index
      %c0_45 = arith.constant 0 : index
      %113 = vector.load %arg3[%c0_44, %c0_45] : memref<1x128xf32, #tpu.memory_space<vmem>>, vector<1x128xf32>
      tpu.vector_store %arg3[%c0_44, %c0_45], %112 {strides = array<i32>} : memref<1x128xf32, #tpu.memory_space<vmem>>, vector<1x128xf32>,
    } else {
    }
    return
  }
  func.func @transform_0(%arg0: i32) -> (i32, i32) {
    %c0_i32 = arith.constant 0 : i32
    %c0_i32_0 = arith.constant 0 : i32
    return %arg0, %c0_i32 : i32, i32
  }
  func.func @transform_1(%arg0: i32) -> (i32, i32) {
    %c0_i32 = arith.constant 0 : i32
    %c0_i32_0 = arith.constant 0 : i32
    %c0_i32_1 = arith.constant 0 : i32
    return %c0_i32, %c0_i32_0 : i32, i32
  }
  func.func @transform_2(%arg0: i32) -> (i32, i32) {
    %c0_i32 = arith.constant 0 : i32
    %c0_i32_0 = arith.constant 0 : i32
    %c0_i32_1 = arith.constant 0 : i32
    return %c0_i32, %c0_i32_0 : i32, i32
  }
}

</mosaic_0001>

<bundles_post_ra>
// kernel: _update_state_pallas.1
= control target key start
LH: loop header
LB: loop body
LE: loop exit
PB: predicated region body
PF: predicated region fallthrough
CT: control target
= control target key end

     0   :  { %7 = vsyncpa [#allocation5], 0  ;;  %s291_s0 = inlined_call_operand.hbm [shape: f32[2,128], index: 0, kind: input, shape index: {}]   ;;  %s292_s1 = inlined_call_operand.hbm [shape: f32[1,128], index: 1, kind: input, shape index: {}, may-alias: {1,2}]   ;;  %s293_s2 = inlined_call_operand.hbm [shape: f32[1,128], index: 2, kind: output, shape index: {}, may-alias: {1,2}]  }
   0x1   :  { %8 = vsyncpa [#allocation7], 0 }
   0x2   :  { %9 = vsyncpa [#allocation6], 0  ;;  %s231_s9 = smov [#allocation4]   ;;  %s171_s13 = scalar_lea.hbm %s291_s0, 32 }
   0x3   :  { %s16_s10 = sshll.u32 %s231_s9, 4  ;;  %p172_p0 = scmp.ne.s32.totalorder %s291_s0, %s171_s13  ;;  %s17_s10 = int_to_ptr.vmem [resolvable:$true] %s16_s10 }
   0x4   :  { %p175_p1 = scmp.lt.u32.totalorder %s171_s13, %s291_s0 }
   0x6   :  { %p177_p2 = pnand %p175_p1, %p172_p0 }
   0x8   :  { %180 = shalt.err (!%p177_p2)
}
   0x9   :  { %s181_s18 = scalar_lea.vmem %s17_s10, 32  ;;  %p186_p4 = scmp.lt.s32.totalorder %s17_s10, %s17_s10 }
   0xa   :  { %p182_p3 = scmp.ne.s32.totalorder %s17_s10, %s181_s18  ;;  %p187_p5 = scmp.lt.s32.totalorder %s181_s18, %s181_s18 }
   0xc   :  { %p188_p6 = por %p187_p5, %p186_p4 }
   0xe   :  { %p189_p7 = pnand %p188_p6, %p182_p3 }
  0x10   :  { %192 = shalt.err (!%p189_p7)
}
  0x11   :  { %19 = dma.hbm_to_vmem [thread:$0]  %s291_s0, 32, %s17_s10, [#allocation5]  }
  0x12   :  { %s193_s23 = scalar_lea.hbm %s292_s1, 16 }
  0x13   :  { %p194_p8 = scmp.ne.s32.totalorder %s292_s1, %s193_s23  ;;  %p197_p9 = scmp.lt.u32.totalorder %s193_s23, %s292_s1 }
  0x15   :  { %p199_p10 = pnand %p197_p9, %p194_p8 }
  0x17   :  { %202 = shalt.err (!%p199_p10)
}
  0x18   :  { %s232_s28 = smov [#allocation8]  }
  0x19   :  { %27 = dma.hbm_to_smem %s292_s1, 16, %s232_s28, [#allocation7]  }
  0x1a   :  { %225 = dma.done.wait [#allocation5], 32  }
  0x1b   :  { %226 = vsyncadd [#allocation5], 4294967264 }
  0x1c   :  { %227 = dma.done.wait [#allocation7], 16  }
  0x1d   :  { %228 = vsyncadd [#allocation7], 4294967280 }
  0x1e   :  { %34 = sfence }
  0x1f   :  { %v41_v0 = vld [vmem:[#allocation4] sm:$0x3]  ;;  %vm42_vm0 = vcmask 1041408   ;;  %v233_v1 = vmov 0.0   ;;  %vm84_vm1 = vcmask 1040384   ;;  %s103_s0 = sld [smem:[#allocation8]]  ;;  %v129_v43 = vlaneseq }
  0x20   :  { %39 = vst [vmem:[#allocation2] sm:$0x1] %v233_v1  ;;  %v43_v2 = vsel %vm42_vm0, %v41_v0, 0.0  ;;  %40 = vst [vmem:[#allocation3] sm:$0x1] %v233_v1  ;;  %s159_s1 = sld [smem:[#allocation8 + $0x1]] }
  0x21   :  { %v44_v3 = vrot.slane %v43_v2, 4  ;;  %s160_s3 = sld [smem:[#allocation8 + $0x2]]  ;;  %v130_v47 = vand.u32 127, %v129_v43  ;;  %s234_s4 = smov [#allocation9]  }
  0x22   :  { %s149_s5 = sshll.u32 %s234_s4, 4  ;;  %s150_s5 = int_to_ptr.vmem [resolvable:$true] %s149_s5 }
  0x23   :  { %v45_v4 = vadd.f32 %v44_v3, %v43_v2  ;;  %vm133_vm2 = vcmp.eq.s32.totalorder %v130_v47, 1  ;;  %vm131_vm3 = vcmp.eq.s32.totalorder %v130_v47, 0  ;;  %vm136_vm4 = vcmp.eq.s32.totalorder %v130_v47, 2  ;;  %s203_s6 = scalar_lea.vmem %s150_s5, 16  ;;  %s207_s7 = scalar_lea.vmem %s150_s5, 32 }
  0x24   :  { %vm139_vm6 = vcmp.eq.s32.totalorder %v130_v47, 3  ;;  %p204_p11 = scmp.ne.s32.totalorder %s150_s5, %s203_s6  ;;  %p208_p12 = scmp.lt.s32.totalorder %s150_s5, %s150_s5 }
  0x25   :  { %v46_v5 = vrot.slane %v45_v4, 2  ;;  %v104_v38 = vstv %s103_s0  ;;  %p209_p13 = scmp.lt.s32.totalorder %s207_s7, %s203_s6 }
  0x26   :  { %165 = vrcp.f32 %v104_v38  ;;  %v113_v39 = vadd.f32 256.0, %v104_v38  ;;  %v106_v41 = vstv %s159_s1  ;;  %v112_v45 = vmul.f32 256.0, %v104_v38 }
  0x27   :  { %v47_v6 = vadd.f32 %v46_v5, %v45_v4  ;;  %v67_v9 = vld [vmem:[#allocation2] sm:$0x1]  ;;  %v69_v26 = vld [vmem:[#allocation3] sm:$0x1]  ;;  %v108_v56 = vstv %s160_s3  ;;  %p210_p0 = por %p209_p13, %p208_p12 }
  0x28   :  { %v75_v11 = vld [vmem:[#allocation2] sm:$0x1]  ;;  %167 = vrcp.f32 %v113_v39  ;;  %v132_v59 = vsel %vm131_vm3, %v113_v39, 0.0 }
  0x29   :  { %v48_v7 = vrot.slane %v47_v6, 1  ;;  %p211_p1 = pnand %p210_p0, %p204_p11 }
  0x2b   :  { %v49_v8 = vadd.f32 %v48_v7, %v47_v6 }
  0x2d   :  { %v50_v10 = vmul.f32 0.5, %v49_v8 }
  0x2f   :  { %v68_v12 = vsub.f32 %v50_v10, %v67_v9  ;;  %v51_v14 = vsub.f32 %v41_v0, %v50_v10 }
  0x30   :  { %v166_v40 = vpop.eup %165 }
  0x31   :  { %v77_v13 = vadd.f32 %v75_v11, %v68_v12  ;;  %v52_v15 = vmul.f32 %v51_v14, %v51_v14  ;;  %v71_v25 = vmul.f32 %v68_v12, %v68_v12  ;;  %v110_v42 = vmul.f32 %v166_v40, %v106_v41 }
  0x32   :  { %v168_v46 = vpop.eup %167 }
  0x33   :  { %78 = vst [vmem:[#allocation2] sm:$0x1] %v77_v13  ;;  %v53_v18 = vsel %vm42_vm0, %v52_v15, 0.0  ;;  %v72_v28 = vmul.f32 0.0, %v71_v25  ;;  %v115_v49 = vmul.f32 %v168_v46, %v112_v45 }
  0x34   :  { %v54_v19 = vrot.slane %v53_v18, 4 }
  0x36   :  { %v55_v20 = vadd.f32 %v54_v19, %v53_v18 }
  0x38   :  { %v56_v21 = vrot.slane %v55_v20, 2 }
  0x3a   :  { %v82_v16 = vld [vmem:[#allocation2] sm:$0x1]  ;;  %v57_v22 = vadd.f32 %v56_v21, %v55_v20 }
  0x3b   :  { %v85_v17 = vsel %vm84_vm1, %v82_v16, 0.0 }
  0x3c   :  { %86 = vadd.xlane.f32.xlu0 %v85_v17  ;;  %v58_v23 = vrot.slane %v57_v22, 1 }
  0x3e   :  { %v59_v24 = vadd.f32 %v58_v23, %v57_v22 }
  0x40   :  { %v70_v27 = vadd.f32 %v69_v26, %v59_v24 }
  0x42   :  { %v73_v29 = vadd.f32 %v72_v28, %v70_v27 }
  0x44   :  { %74 = vst [vmem:[#allocation3] sm:$0x1] %v73_v29 }
  0x4b   :  { %v83_v30 = vld [vmem:[#allocation3] sm:$0x1] }
  0x4c   :  { %v92_v31 = vsel %vm84_vm1, %v83_v30, 0.0 }
  0x4d   :  { %93 = vadd.xlane.f32.xlu1 %v92_v31 }
  0xc9   :  { %v87_v32 = vpop.xlane.xlu0 %86 }
  0xca   :  { %v89_v33 = vmul.f32 2.0, %v87_v32 }
  0xcc   :  { %v90_v34 = vmul.f32 0.00390625, %v89_v33  ;;  %v119_v52 = vadd.f32 %v106_v41, %v89_v33 }
  0xce   :  { %v91_v35 = vsub.f32 %v82_v16, %v90_v34  ;;  %v111_v44 = vsub.f32 %v90_v34, %v110_v42  ;;  %v134_v57 = vsel %vm133_vm2, %v119_v52, 0.0 }
  0xcf   :  { %v135_v61 = vadd.f32 %v134_v57, %v132_v59 }
  0xd0   :  { %v96_v36 = vmul.f32 %v91_v35, %v91_v35  ;;  %v116_v48 = vmul.f32 %v111_v44, %v111_v44 }
  0xd2   :  { %v97_v37 = vsel %vm84_vm1, %v96_v36, 0.0  ;;  %v117_v54 = vmul.f32 %v116_v48, %v115_v49 }
  0xd3   :  { %98 = vadd.xlane.f32.xlu0 %v97_v37 }
  0xda   :  { %v94_v51 = vpop.xlane.xlu1 %93 }
 0x160   :  { %v99_v50 = vpop.xlane.xlu0 %98 }
 0x161   :  { %v101_v53 = vmul.f32 2.0, %v99_v50 }
 0x163   :  { %v102_v55 = vadd.f32 %v101_v53, %v94_v51 }
 0x165   :  { %v118_v58 = vadd.f32 %v117_v54, %v102_v55 }
 0x167   :  { %v120_v60 = vadd.f32 %v118_v58, %v108_v56 }
 0x169   :  { %v121_v62 = vmul.f32 %v168_v46, %v120_v60  ;;  %v137_v63 = vsel %vm136_vm4, %v120_v60, 0.0 }
 0x16a   :  { %v138_v0 = vadd.f32 %v137_v63, %v135_v61 }
 0x16b   :  { %169 = vrsqrt.f32 %v121_v62  ;;  %vm124_vm5 = vcmp.eq.f32.partialorder %v121_v62, inf  ;;  %v127_v3 = vand.u32 2147483648, %v121_v62  ;;  %vm126_vm7 = vcmp.eq.f32.partialorder %v121_v62, 0.0 }
 0x175   :  { %v170_v1 = vpop.eup %169 }
 0x176   :  { %v123_v2 = vmul.f32 %v170_v1, %v121_v62 }
 0x178   :  { %v125_v4 = vsel %vm124_vm5, %v121_v62, %v123_v2 }
 0x179   :  { %v128_v5 = vsel %vm126_vm7, %v127_v3, %v125_v4 }
 0x17a   :  { %v140_v6 = vsel %vm139_vm6, %v128_v5, 0.0 }
 0x17b   :  { %v141_v7 = vadd.f32 %v140_v6, %v138_v0 }
 0x17d   :  { %142 = vst [vmem:[#allocation9] sm:$0x1] %v141_v7 }
 0x17e   :  { %214 = shalt.err (!%p211_p1)
}
 0x17f   :  { %s215_s10 = scalar_lea.hbm %s293_s2, 16 }
 0x180   :  { %p216_p2 = scmp.ne.s32.totalorder %s293_s2, %s215_s10  ;;  %p219_p3 = scmp.lt.u32.totalorder %s215_s10, %s293_s2 }
 0x182   :  { %p221_p4 = pnand %p219_p3, %p216_p2 }
 0x184   :  { %224 = shalt.err (!%p221_p4)
}
 0x185   :  { %152 = dma.vmem_to_hbm [thread:$0]  %s150_s5, 16, %s293_s2, [#allocation6]  }
 0x186   :  { %229 = dma.done.wait [#allocation6], 16  }
 0x187   :  { %230 = vsyncadd [#allocation6], 4294967280 }
 0x188   :  { %156 = vsyncpa [#allocation5], 1 }
 0x189   :  { %157 = vsyncpa [#allocation6], 1 }
 0x18a   :  { %158 = vsyncpa [#allocation7], 1 }

</bundles_post_ra>
